<compile_context>
chip_gen: v7x
topology: tpu7x:2x2x1
jax: 0.10.0
libtpu: 0.0.40
codegen_flags: <defaults>
</compile_context>

<pallas_src>
import jax
import jax.numpy as jnp
from jax.experimental import pallas as pl
from jax.experimental.pallas import tpu as pltpu


def split_space_kernel(x_ref, se_ref, so_ref, o_ref):
    # x_ref : (1, tc, th2, 2W)   folded rows: lanes [0,W) = even row, [W,2W) = odd row
    # se_ref: (CH, CH//2)        0/1 selector picking even columns of a CH-wide chunk
    # so_ref: (CH, CH//2)        0/1 selector picking odd  columns of a CH-wide chunk
    # o_ref : (1, 4, tc, th2, W2) quadrant order [ee, oe, eo, oo]
    _, tc, th2, two_w = x_ref.shape
    ch, ch_half = se_ref.shape
    w = two_w // 2
    n_col_chunks = w // ch          # chunks per (even|odd) row half
    m = tc * th2

    se = se_ref[...]
    so = so_ref[...]
    # Exact f32 pass-through through a 0/1 matrix requires full precision on TPU.
    prec = jax.lax.Precision.HIGHEST if x_ref.dtype == jnp.float32 else None

    # Static (unrolled) loop over 256-lane chunks of the folded rows.
    for t in range(2 * n_col_chunks):
        row_par = t // n_col_chunks                 # 0 -> even rows, 1 -> odd rows
        col_off = (t % n_col_chunks) * ch_half      # 128-aligned when CH == 256
        chunk = x_ref[0, :, :, t * ch:(t + 1) * ch].reshape(m, ch)
        ye = jnp.dot(chunk, se, preferred_element_type=jnp.float32, precision=prec)
        yo = jnp.dot(chunk, so, preferred_element_type=jnp.float32, precision=prec)
        # even columns -> quadrant row_par (ee / oe), odd columns -> 2 + row_par (eo / oo)
        o_ref[0, row_par, :, :, col_off:col_off + ch_half] = (
            ye.astype(o_ref.dtype).reshape(tc, th2, ch_half))
        o_ref[0, 2 + row_par, :, :, col_off:col_off + ch_half] = (
            yo.astype(o_ref.dtype).reshape(tc, th2, ch_half))


def split_space(x, *, vmem_budget_bytes=None, vmem_limit_bytes=None):
    N, C, H, W = x.shape
    assert H % 2 == 0 and W % 2 == 0, "H and W must be even"
    if not jnp.issubdtype(x.dtype, jnp.floating):
        # TODO(synk): integer dtypes need a non-MXU de-interleave path (v7x MXU has no int mode).
        raise NotImplementedError("split_space Pallas kernel supports floating dtypes only")

    H2, W2 = H // 2, W // 2
    itemsize = jnp.dtype(x.dtype).itemsize

    # Banded 256-wide column chunks when possible; dense fallback for small/odd widths.
    CH = 256 if W % 256 == 0 else W
    ch_half = CH // 2

    # Constant 0/1 selectors (built once, stay VMEM-resident: block index never changes).
    j = jnp.arange(CH)[:, None]
    k = jnp.arange(ch_half)[None, :]
    se = (j == 2 * k).astype(x.dtype)        # even columns of a chunk
    so = (j == 2 * k + 1).astype(x.dtype)    # odd  columns of a chunk

    # Generation-aware VMEM budget (v5e/v6e: 128 MiB physical, v7x: 64 MiB).
    try:
        phys = int(pltpu.get_tpu_info().vmem_capacity_bytes)
    except Exception:
        phys = 64 * 1024 * 1024   # conservative default (v7x-sized)
    big_vmem = phys >= 96 * 1024 * 1024
    if vmem_budget_bytes is None:
        vmem_budget_bytes = (56 if big_vmem else 26) * 1024 * 1024
    if vmem_limit_bytes is None:
        vmem_limit_bytes = (96 if big_vmem else 40) * 1024 * 1024

    sel_bytes = 2 * 2 * CH * ch_half * itemsize      # two selectors, double-buffered
    lanes_pad = -(-W2 // 128) * 128                  # output lane padding

    def footprint(tc, th2):
        rows_pad = -(-th2 // 8) * 8
        in_blk = tc * th2 * 2 * W * itemsize                       # (1,tc,th2,2W)
        out_blk = 4 * tc * rows_pad * lanes_pad * itemsize         # padded output block
        interm = tc * th2 * CH * (itemsize + 8)                    # chunk + two f32 results
        return 2 * in_blk + 2 * out_blk + interm + sel_bytes

    c_divs = [d for d in range(C, 0, -1) if C % d == 0]
    if H2 % 8 == 0:
        h_divs = [d for d in range(H2, 0, -1) if H2 % d == 0 and d % 8 == 0]
    else:
        h_divs = [H2]          # must keep the full (non-8-divisible) row extent

    # Pick the largest channel tile (full rows) that fits; fall back to row tiling.
    tc, th2 = 1, h_divs[-1]
    chosen = False
    for d in c_divs:
        if footprint(d, H2) <= vmem_budget_bytes:
            tc, th2, chosen = d, H2, True
            break
    if not chosen:
        for h in h_divs:
            if footprint(1, h) <= vmem_budget_bytes:
                tc, th2, chosen = 1, h, True
                break
        if not chosen:
            tc, th2 = 1, h_divs[-1]   # smallest legal tile; rely on vmem_limit headroom

    # v7x has 2 TensorCores: make sure the (all-parallel) grid has enough steps to shard.
    def n_steps(tc_, th2_):
        return N * (C // tc_) * (H2 // th2_)
    while n_steps(tc, th2) < 8:
        smaller_tc = [d for d in c_divs if d < tc]
        if smaller_tc:
            tc = smaller_tc[0]
            continue
        smaller_h = [h for h in h_divs if h < th2]
        if smaller_h:
            th2 = smaller_h[0]
            continue
        break

    grid = (N, C // tc, H2 // th2)

    # Free reshape: each super-row i holds original row 2i in lanes [0,W) and 2i+1 in [W,2W).
    x_folded = x.reshape(N, C, H2, 2 * W)

    out5 = pl.pallas_call(
        split_space_kernel,
        out_shape=jax.ShapeDtypeStruct((N, 4, C, H2, W2), x.dtype),
        grid=grid,
        in_specs=[
            pl.BlockSpec((1, tc, th2, 2 * W), lambda n, c, h: (n, c, h, 0)),
            pl.BlockSpec((CH, ch_half), lambda n, c, h: (0, 0)),
            pl.BlockSpec((CH, ch_half), lambda n, c, h: (0, 0)),
        ],
        out_specs=pl.BlockSpec((1, 4, tc, th2, W2), lambda n, c, h: (n, 0, c, h, 0)),
        compiler_params=pltpu.CompilerParams(
            dimension_semantics=("parallel", "parallel", "parallel"),
            vmem_limit_bytes=vmem_limit_bytes,
        ),
        cost_estimate=pl.CostEstimate(
            flops=2 * N * C * H * W * CH,                 # banded selector matmuls
            transcendentals=0,
            bytes_accessed=2 * N * C * H * W * itemsize,  # read + write (memory-bound op)
        ),
    )(x_folded, se, so)

    # (N, 4, C, H/2, W/2) -> (N, 4C, H/2, W/2): contiguous, free reshape matching
    # torch.cat([ee, oe, eo, oo], dim=1).
    return out5.reshape(N, 4 * C, H2, W2)


if __name__ == "__main__":
    key = jax.random.PRNGKey(0)
    x = jax.random.normal(key, (2, 4, 16, 16), dtype=jnp.float32)

    out = jax.block_until_ready(split_space(x))

    # Pure-JAX reference mirroring the PyTorch forward.
    ref = jnp.concatenate(
        [x[..., ::2, ::2], x[..., 1::2, ::2], x[..., ::2, 1::2], x[..., 1::2, 1::2]],
        axis=1,
    )

    assert out.shape == ref.shape == (2, 16, 8, 8), (out.shape, ref.shape)
    assert jnp.array_equal(out, ref), "mismatch vs reference"
    print("KERNEL_OK")
</pallas_src>

<mosaic_0001>
module attributes {stable_mosaic.version = 11 : i64} {
  func.func @split_space_kernel(%arg0: i32, %arg1: i32, %arg2: i32, %arg3: memref<1x1x8x32xf32, #tpu.memory_space<vmem>>, %arg4: memref<16x8xf32, #tpu.memory_space<vmem>>, %arg5: memref<16x8xf32, #tpu.memory_space<vmem>>, %arg6: memref<1x4x1x8x8xf32, #tpu.memory_space<vmem>>) attributes {dimension_semantics = [#tpu.dimension_semantics<parallel>, #tpu.dimension_semantics<parallel>, #tpu.dimension_semantics<parallel>], iteration_bounds = array<i64: 2, 4, 1>, scalar_prefetch = 0 : i64, scratch_operands = 0 : i64, tpu.core_type = #tpu.core_type<tc>, window_params = [{transform_indices = @transform_0, window_bounds = array<i64: 1, 1, 8, 32>}, {pipeline_mode = #tpu.pipeline_mode<synchronous>, transform_indices = @transform_1, window_bounds = array<i64: 16, 8>}, {pipeline_mode = #tpu.pipeline_mode<synchronous>, transform_indices = @transform_2, window_bounds = array<i64: 16, 8>}, {transform_indices = @transform_3, window_bounds = array<i64: 1, 4, 1, 8, 8>}]} {
    %c0 = arith.constant 0 : index
    %c0_0 = arith.constant 0 : index
    %0 = vector.load %arg4[%c0, %c0_0] : memref<16x8xf32, #tpu.memory_space<vmem>>, vector<16x8xf32>
    %c0_1 = arith.constant 0 : index
    %c0_2 = arith.constant 0 : index
    %1 = vector.load %arg5[%c0_1, %c0_2] : memref<16x8xf32, #tpu.memory_space<vmem>>, vector<16x8xf32>
    %c0_3 = arith.constant 0 : index
    %c0_4 = arith.constant 0 : index
    %c0_5 = arith.constant 0 : index
    %c0_6 = arith.constant 0 : index
    %2 = vector.load %arg3[%c0_3, %c0_4, %c0_5, %c0_6] : memref<1x1x8x32xf32, #tpu.memory_space<vmem>>, vector<1x1x8x16xf32>
    %3 = vector.shape_cast %2 : vector<1x1x8x16xf32> to vector<1x8x16xf32>
    %4 = vector.shape_cast %3 : vector<1x8x16xf32> to vector<8x16xf32>
    %cst = arith.constant dense<0.000000e+00> : vector<8x8xf32>
    %5 = tpu.matmul %4, %0, %cst {dimension_numbers = #tpu.dot_dimension_numbers<[1], [0], [0], [1], [0, 0, 1, 1], [], []>, precision = #tpu.contract_precision<fp32>} : vector<8x16xf32>, vector<16x8xf32>, vector<8x8xf32> -> vector<8x8xf32>
    %cst_7 = arith.constant dense<0.000000e+00> : vector<8x8xf32>
    %6 = tpu.matmul %4, %1, %cst_7 {dimension_numbers = #tpu.dot_dimension_numbers<[1], [0], [0], [1], [0, 0, 1, 1], [], []>, precision = #tpu.contract_precision<fp32>} : vector<8x16xf32>, vector<16x8xf32>, vector<8x8xf32> -> vector<8x8xf32>
    %7 = vector.shape_cast %5 : vector<8x8xf32> to vector<1x8x8xf32>
    %c0_8 = arith.constant 0 : index
    %c0_9 = arith.constant 0 : index
    %c0_10 = arith.constant 0 : index
    %c0_11 = arith.constant 0 : index
    %c0_12 = arith.constant 0 : index
    %8 = vector.load %arg6[%c0_8, %c0_9, %c0_10, %c0_11, %c0_12] : memref<1x4x1x8x8xf32, #tpu.memory_space<vmem>>, vector<1x1x1x8x8xf32>
    %9 = vector.shape_cast %8 : vector<1x1x1x8x8xf32> to vector<1x8x8xf32>
    %10 = vector.shape_cast %7 : vector<1x8x8xf32> to vector<1x1x1x8x8xf32>
    tpu.vector_store %arg6[%c0_8, %c0_9, %c0_10, %c0_11, %c0_12], %10 {strides = array<i32>} : memref<1x4x1x8x8xf32, #tpu.memory_space<vmem>>, vector<1x1x1x8x8xf32>,
    %11 = vector.shape_cast %6 : vector<8x8xf32> to vector<1x8x8xf32>
    %c0_13 = arith.constant 0 : index
    %c2 = arith.constant 2 : index
    %c0_14 = arith.constant 0 : index
    %c0_15 = arith.constant 0 : index
    %c0_16 = arith.constant 0 : index
    %12 = vector.load %arg6[%c0_13, %c2, %c0_14, %c0_15, %c0_16] : memref<1x4x1x8x8xf32, #tpu.memory_space<vmem>>, vector<1x1x1x8x8xf32>
    %13 = vector.shape_cast %12 : vector<1x1x1x8x8xf32> to vector<1x8x8xf32>
    %14 = vector.shape_cast %11 : vector<1x8x8xf32> to vector<1x1x1x8x8xf32>
    tpu.vector_store %arg6[%c0_13, %c2, %c0_14, %c0_15, %c0_16], %14 {strides = array<i32>} : memref<1x4x1x8x8xf32, #tpu.memory_space<vmem>>, vector<1x1x1x8x8xf32>,
    %c0_17 = arith.constant 0 : index
    %c0_18 = arith.constant 0 : index
    %c0_19 = arith.constant 0 : index
    %c16 = arith.constant 16 : index
    %15 = vector.load %arg3[%c0_17, %c0_18, %c0_19, %c16] : memref<1x1x8x32xf32, #tpu.memory_space<vmem>>, vector<1x1x8x16xf32>
    %16 = vector.shape_cast %15 : vector<1x1x8x16xf32> to vector<1x8x16xf32>
    %17 = vector.shape_cast %16 : vector<1x8x16xf32> to vector<8x16xf32>
    %cst_20 = arith.constant dense<0.000000e+00> : vector<8x8xf32>
    %18 = tpu.matmul %17, %0, %cst_20 {dimension_numbers = #tpu.dot_dimension_numbers<[1], [0], [0], [1], [0, 0, 1, 1], [], []>, precision = #tpu.contract_precision<fp32>} : vector<8x16xf32>, vector<16x8xf32>, vector<8x8xf32> -> vector<8x8xf32>
    %cst_21 = arith.constant dense<0.000000e+00> : vector<8x8xf32>
    %19 = tpu.matmul %17, %1, %cst_21 {dimension_numbers = #tpu.dot_dimension_numbers<[1], [0], [0], [1], [0, 0, 1, 1], [], []>, precision = #tpu.contract_precision<fp32>} : vector<8x16xf32>, vector<16x8xf32>, vector<8x8xf32> -> vector<8x8xf32>
    %20 = vector.shape_cast %18 : vector<8x8xf32> to vector<1x8x8xf32>
    %c0_22 = arith.constant 0 : index
    %c1 = arith.constant 1 : index
    %c0_23 = arith.constant 0 : index
    %c0_24 = arith.constant 0 : index
    %c0_25 = arith.constant 0 : index
    %21 = vector.load %arg6[%c0_22, %c1, %c0_23, %c0_24, %c0_25] : memref<1x4x1x8x8xf32, #tpu.memory_space<vmem>>, vector<1x1x1x8x8xf32>
    %22 = vector.shape_cast %21 : vector<1x1x1x8x8xf32> to vector<1x8x8xf32>
    %23 = vector.shape_cast %20 : vector<1x8x8xf32> to vector<1x1x1x8x8xf32>
    tpu.vector_store %arg6[%c0_22, %c1, %c0_23, %c0_24, %c0_25], %23 {strides = array<i32>} : memref<1x4x1x8x8xf32, #tpu.memory_space<vmem>>, vector<1x1x1x8x8xf32>,
    %24 = vector.shape_cast %19 : vector<8x8xf32> to vector<1x8x8xf32>
    %c0_26 = arith.constant 0 : index
    %c3 = arith.constant 3 : index
    %c0_27 = arith.constant 0 : index
    %c0_28 = arith.constant 0 : index
    %c0_29 = arith.constant 0 : index
    %25 = vector.load %arg6[%c0_26, %c3, %c0_27, %c0_28, %c0_29] : memref<1x4x1x8x8xf32, #tpu.memory_space<vmem>>, vector<1x1x1x8x8xf32>
    %26 = vector.shape_cast %25 : vector<1x1x1x8x8xf32> to vector<1x8x8xf32>
    %27 = vector.shape_cast %24 : vector<1x8x8xf32> to vector<1x1x1x8x8xf32>
    tpu.vector_store %arg6[%c0_26, %c3, %c0_27, %c0_28, %c0_29], %27 {strides = array<i32>} : memref<1x4x1x8x8xf32, #tpu.memory_space<vmem>>, vector<1x1x1x8x8xf32>,
    return
  }
  func.func @transform_0(%arg0: i32, %arg1: i32, %arg2: i32) -> (i32, i32, i32, i32) {
    %c0_i32 = arith.constant 0 : i32
    %c0_i32_0 = arith.constant 0 : i32
    return %arg0, %arg1, %arg2, %c0_i32 : i32, i32, i32, i32
  }
  func.func @transform_1(%arg0: i32, %arg1: i32, %arg2: i32) -> (i32, i32) {
    %c0_i32 = arith.constant 0 : i32
    %c0_i32_0 = arith.constant 0 : i32
    %c0_i32_1 = arith.constant 0 : i32
    return %c0_i32, %c0_i32_0 : i32, i32
  }
  func.func @transform_2(%arg0: i32, %arg1: i32, %arg2: i32) -> (i32, i32) {
    %c0_i32 = arith.constant 0 : i32
    %c0_i32_0 = arith.constant 0 : i32
    %c0_i32_1 = arith.constant 0 : i32
    return %c0_i32, %c0_i32_0 : i32, i32
  }
  func.func @transform_3(%arg0: i32, %arg1: i32, %arg2: i32) -> (i32, i32, i32, i32, i32) {
    %c0_i32 = arith.constant 0 : i32
    %c0_i32_0 = arith.constant 0 : i32
    %c0_i32_1 = arith.constant 0 : i32
    return %arg0, %c0_i32, %arg1, %arg2, %c0_i32_0 : i32, i32, i32, i32, i32
  }
}

</mosaic_0001>

<bundles_post_ra>
// kernel: tpu_custom_call.1
= control target key start
LH: loop header
LB: loop body
LE: loop exit
PB: predicated region body
PF: predicated region fallthrough
CT: control target
= control target key end

     0   :  { %8 = vsyncpa [#allocation3], 0  ;;  %s3110_s0 = inlined_call_operand.hbm [shape: f32[2,4,8,32], index: 0, kind: input, shape index: {}]   ;;  %s3111_s1 = inlined_call_operand.vmem [shape: f32[16,8], index: 1, kind: input, shape index: {}]   ;;  %s3112_s2 = inlined_call_operand.vmem [shape: f32[16,8], index: 2, kind: input, shape index: {}]   ;;  %s3113_s3 = inlined_call_operand.hbm [shape: f32[2,4,4,8,8], index: 3, kind: output, shape index: {}]  }
   0x1   :  { %10 = vsyncpa [#allocation3 + $0x1], 0 }
   0x2   :  { %11 = vsyncpa [#allocation4], 0 }
   0x3   :  { %13 = vsyncpa [#allocation4 + $0x1], 0  ;;  %s2798_s12 = smov 0   ;;  %s2800_s13 = smov 0  }
   0x4   :  { %s2802_s14 = smov 0   ;;  %s2804_s15 = smov 0  }
   0x5   :  { %s2806_s16 = smov 0   ;;  %s2808_s17 = smov 0  }
   0x6   :  { %s2810_s18 = smov 0   ;;  %s2812_s19 = smov 0  }
   0x7 LB: > { %s2184_s20 = sadd.s32 4294967295, %s2767_s19   ;;  %s2185_s21 = sadd.s32 4294967294, %s2767_s19   ;;  %s2767_s19 = sphi %s2812_s19, %s19_s19   ;;  %s2763_s18 = sphi %s2810_s18, %s3130_s18   ;;  %s2759_s17 = sphi %s2808_s17, %s3129_s17   ;;  %s2755_s16 = sphi %s2806_s16, %s3128_s16   ;;  %s2751_s15 = sphi %s2804_s15, %s3127_s15   ;;  %s2747_s14 = sphi %s2802_s14, %s3126_s14   ;;  %s2743_s13 = sphi %s2800_s13, %s3125_s13   ;;  %s2739_s12 = sphi %s2798_s12, %s3124_s12  }
   0x8   : > { %s34_s22 = sadd.s32 1, %s2759_s17  ;;  %s38_s23 = sadd.s32 1, %s2763_s18 }
   0x9   : > { %p36_p0 = scmp.ge.s32.totalorder %s34_s22, 4  ;;  %s49_s24 = sadd.s32 1, %s2747_s14 }
   0xa   : > { %p56_p1 = scmp.ne.s32.totalorder %s2747_s14, %s2743_s13  ;;  %p57_p2 = scmp.eq.s32.totalorder %s2767_s19, 0 }
   0xb   : > { %s3132_s22 = smov (%p36_p0, %s34_s22), 0  ;;  %s3134_s23 = smov (!%p36_p0, %s38_s23), %s2763_s18 }
   0xc   : > { %s43_s25 = ssub.s32 %s2759_s17, %s3132_s22  ;;  %p2851_p3 = por %p57_p2, %p56_p1 }
   0xd   : > { %p40_p4 = scmp.ge.s32.totalorder %s3134_s23, 2  ;;  %p62_p5 = scmp.ne.s32.totalorder %s2743_s13, %s2739_s12 }
   0xe   : > { %p63_p6 = scmp.eq.s32.totalorder %s2184_s20, 0  ;;  %p132_p7 = scmp.eq.s32.totalorder %s2184_s20, 7 }
   0xf   : > { %s3136_s23 = smov (%p40_p4, %s3134_s23), 0  ;;  %p138_p10 = scmp.eq.s32.totalorder %s2185_s21, 7 }
  0x10   : > { %p2859_p8 = por %p63_p6, %p62_p5  ;;  %p2863_p9 = por %p132_p7, %p56_p1 }
  0x11   : > { %s42_s29 = ssub.s32 %s2763_s18, %s3136_s23  ;;  %p2869_p12 = por %p138_p10, %p62_p5 }
  0x12   : > { %s3117_s28 = scalar_select %p2863_p9, 1, 0 }
  0x13   : > { %s44_s30 = sor.u32 %s43_s25, %s42_s29  ;;  %p2566_p13 = scmp.lt.s32.totalorder %s2767_s19, 8 }
  0x14   : > { %p47_p11 = scmp.eq.s32.totalorder %s44_s30, 0  ;;  %s164_s5 = sand.u32 1, %s2747_s14  }
  0x15   : > { %s3118_s4 = scalar_select %p2869_p12, 1, 0 }
  0x16   : > { %s2876_s6 = scalar_select %p47_p11, %s2747_s14, %s49_s24  }
  0x17   : > { %s2188_s7 = sshll.u32 %s164_s5, 3  ;;  %s2189_s8 = sshll.u32 %s2763_s18, 2 }
  0x18   : > { %s174_s9 = sadd.s32 %s2759_s17, %s2189_s8  ;;  %s168_s10 = scalar_lea.vmem [#allocation2], %s2188_s7 }
  0x19   : > { %s178_s11 = sshll.u32 %s168_s10, 4  ;;  %s2190_s20 = sshll.u32 %s174_s9, 7  ;;  %s2880_s11 = int_to_ptr.vmem [resolvable:$true] %s178_s11 }
  0x1a   : > { %s2885_s29 = scalar_lea.hbm %s3110_s0, %s2190_s20  ;;  %p2889_p0 = pnand %p2566_p13, %p2851_p3 }
  0x1b   : > { %s165_s30 = scalar_lea.sflag [#allocation3], %s164_s5  ;;  %s2639_s7 = scalar_lea.hbm %s2885_s29, 128 }
  0x1c   : > { %p2640_p4 = scmp.ne.s32.totalorder %s2885_s29, %s2639_s7  ;;  %p2641_p5 = pneg %p2889_p0 }
  0x1d   : > { %s2644_s9 = scalar_lea.hbm %s3110_s0, 1024  ;;  %p2645_p3 = scmp.lt.u32.totalorder %s2885_s29, %s3110_s0 }
  0x1e   : > { %p2642_p6 = pnand %p2641_p5, %p2640_p4  ;;  %p2646_p10 = scmp.lt.u32.totalorder %s2644_s9, %s2639_s7 }
  0x1f   : > { %p2648_p13 = scmp.lt.u32.totalorder %s2639_s7, %s2885_s29 }
  0x20   : > { %p2643_p7 = pneg %p2642_p6  ;;  %p2647_p11 = por %p2646_p10, %p2645_p3 }
  0x22   : > { %p2649_p1 = por %p2648_p13, %p2647_p11 }
  0x24   : > { %p2650_p2 = pnand %p2649_p1, %p2643_p7 }
  0x26   : > { %2653 = shalt.err (!%p2650_p2)
}
  0x27   : > { %s2654_s5 = scalar_lea.vmem %s2880_s11, 128  ;;  %s2769_s21 = smov [#allocation2]  }
  0x28   : > { %p2655_p4 = scmp.ne.s32.totalorder %s2880_s11, %s2654_s5  ;;  %s2659_s25 = sshll.u32 %s2769_s21, 4  ;;  %s2660_s25 = int_to_ptr.vmem [resolvable:$false] %s2659_s25 }
  0x29   : > { %s2661_s26 = scalar_lea.vmem %s2660_s25, 256  ;;  %p2662_p9 = scmp.lt.s32.totalorder %s2880_s11, %s2660_s25 }
  0x2a   : > { %p2657_p6 = pnand %p2655_p4, %p2641_p5  ;;  %p2663_p3 = scmp.lt.s32.totalorder %s2661_s26, %s2654_s5 }
  0x2c   : > { %p2658_p12 = pneg %p2657_p6  ;;  %p2664_p10 = por %p2663_p3, %p2662_p9 }
  0x2e   : > { %p2665_p11 = pnand %p2664_p10, %p2658_p12 }
  0x30   : > { %2668 = shalt.err (!%p2665_p11)
}
  0x31   : > { %2561 = dma.hbm_to_vmem [thread:$0]  (!%p2889_p0), %s2885_s29, 128, %s2880_s11, %s165_s30  }
  0x32   : > { %p3120_p1 = scmp.lt.s32.totalorder %s2767_s19, 9  ;;  %p3121_p2 = scmp.ge.s32.totalorder %s2767_s19, 1 }
  0x34   : > { %p184_p5 = pnand %p3121_p2, %p3120_p1 }
  0x35   : > { %s2925_s7 = sand.u32 (!%p184_p5), 1, %s2743_s13  }
  0x36   : > { %187 = sbr.rel (%p184_p5) target bundleno = 459 (0x1cb), region = 32  ;;  %s2192_s8 = sshll.u32 (!%p184_p5), %s2925_s7, 3 }
  0x37   : > { %s190_s9 = scalar_lea.sflag (!%p184_p5), [#allocation3], %s2925_s7  ;;  %s193_s10 = scalar_lea.vmem (!%p184_p5), [#allocation2], %s2192_s8 }
  0x3d   : > { %2730 = dma.done.wait (%p2859_p8), %s190_s9, 128  }
  0x3e   : > { %2732 = vsyncadd (%p2859_p8), %s190_s9, 4294967168  ;;  %v2770_v0 = vmov 0.0|0.0   ;;  %vm2771_vm0 = vmmov 0   ;;  %v2772_v1 = vmov 0.0   ;;  %vm221_vm1 = vcmask 130048   ;;  %v1147_v2 = vld [vmem:[%s193_s10] sm:$0xff] }
  0x3f   : > { %2442 = vmatprep.subr.bf16.mxu0 %v2770_v0  ;;  %2460 = vmatprep.subr.bf16.mxu1 %v2770_v0  ;;  %v216_v3 = vld [vmem:[%s3111_s1] sm:$0xff]  ;;  %v217_v4 = vld [vmem:[%s3111_s1 + $0x8] sm:$0xff]  ;;  %s2773_s30 = smov 112   ;;  %v223_v9 = vsel %vm221_vm1, %v1147_v2, 0  ;;  %s2193_s26 = sshll.u32 %s2925_s7, 5  ;;  %vm1143_vm2 = vcmask 64512  }
  0x40   : > { %2278 = vmatprep.mubr.msk.f32.mxu0 %vm2771_vm0, %v2772_v1  ;;  %2320 = vmatprep.mubr.msk.f32.mxu1 %vm2771_vm0, %v2772_v1  ;;  %v226_v5 = vand.u32 4294901760, %v216_v3  ;;  %v229_v6 = vand.u32 4294901760, %v217_v4  ;;  %v218_v7 = vld [vmem:[%s3112_s2] sm:$0xff]  ;;  %v219_v8 = vld [vmem:[%s3112_s2 + $0x8] sm:$0xff]  ;;  %v2952_v12 = vand.u32 4294901760, %v223_v9  ;;  %s215_s8 = scalar_lea.vmem [#allocation5], %s2193_s26 }
  0x41   : > { %1149 = vrot.lane.b32.xlu0 %v1147_v2, %s2773_s30  ;;  %v685_v10 = vand.u32 4294901760, %v218_v7  ;;  %v688_v11 = vand.u32 4294901760, %v219_v8  ;;  %s2198_s9 = sshll.u32 %s2755_s16, 4  ;;  %s2091_s11 = sshll.u32 %s215_s8, 4  ;;  %s3049_s11 = int_to_ptr.vmem [resolvable:$true] %s2091_s11 }
  0x42   : > { %v2954_v13 = vpack.c.bf16 %v229_v6, %v226_v5  ;;  %v304_v14 = vsub.f32 %v216_v3, %v226_v5  ;;  %v311_v15 = vsub.f32 %v217_v4, %v229_v6  ;;  %v293_v17 = vsub.f32 %v223_v9, %v2952_v12  ;;  %s2088_s10 = sadd.s32 %s2751_s15, %s2198_s9  ;;  %s2076_s15 = scalar_lea.sflag [#allocation4], %s2925_s7 }
  0x43   : > { %v2956_v16 = vpack.c.bf16 %v688_v11, %v685_v10  ;;  %v763_v18 = vsub.f32 %v218_v7, %v685_v10  ;;  %v770_v19 = vsub.f32 %v219_v8, %v688_v11  ;;  %s2199_s29 = sshll.u32 %s2088_s10, 7  ;;  %s2669_s16 = scalar_lea.vmem %s3049_s11, 512 }
  0x44   : > { %2444 = vmatpush3.bf16.msra.mxu0 %v2954_v13  ;;  %v305_v20 = vand.u32 4294901760, %v304_v14  ;;  %v312_v21 = vand.u32 4294901760, %v311_v15  ;;  %v294_v22 = vand.u32 4294901760, %v293_v17  ;;  %v2449_v37 = vpack.c.bf16 %v311_v15, %v304_v14  ;;  %s3054_s30 = scalar_lea.hbm %s3113_s3, %s2199_s29  ;;  %p2670_p8 = scmp.ne.s32.totalorder %s3049_s11, %s2669_s16 }
  0x45   : > { %2462 = vmatpush3.bf16.msra.mxu1 %v2956_v16  ;;  %2445 = vmatprep.subr.bf16.mxu0 %v2770_v0  ;;  %v764_v23 = vand.u32 4294901760, %v763_v18  ;;  %v771_v24 = vand.u32 4294901760, %v770_v19  ;;  %v2467_v38 = vpack.c.bf16 %v770_v19, %v763_v18  ;;  %p3122_p9 = scmp.ne.s32.totalorder %s3117_s28, 0  ;;  %s2774_s20 = smov [#allocation5]  }
  0x46   : > { %2463 = vmatprep.subr.bf16.mxu1 %v2770_v0  ;;  %v306_v25 = vsub.f32 %v304_v14, %v305_v20  ;;  %v313_v26 = vsub.f32 %v311_v15, %v312_v21  ;;  %v295_v27 = vsub.f32 %v293_v17, %v294_v22  ;;  %v2455_v39 = vpack.c.bf16 %v312_v21, %v305_v20  ;;  %s2673_s5 = sshll.u32 %s2774_s20, 4  ;;  %s2674_s5 = int_to_ptr.vmem [resolvable:$false] %s2673_s5 }
  0x47   : > { %v765_v28 = vsub.f32 %v763_v18, %v764_v23  ;;  %v772_v29 = vsub.f32 %v770_v19, %v771_v24  ;;  %v2473_v40 = vpack.c.bf16 %v771_v24, %v764_v23  ;;  %p2671_p12 = pnand %p2670_p8, %p3122_p9  ;;  %s2675_s21 = scalar_lea.vmem %s2674_s5, 1024 }
  0x48   : > { %v307_v30 = vand.u32 4294901760, %v306_v25  ;;  %v314_v31 = vand.u32 4294901760, %v313_v26  ;;  %v296_v32 = vand.u32 4294901760, %v295_v27  ;;  %p2676_p7 = scmp.lt.s32.totalorder %s3049_s11, %s2674_s5  ;;  %p2677_p13 = scmp.lt.s32.totalorder %s2675_s21, %s2669_s16 }
  0x49   : > { %v766_v33 = vand.u32 4294901760, %v765_v28  ;;  %v773_v34 = vand.u32 4294901760, %v772_v29  ;;  %p2672_p0 = pneg %p2671_p12 }
  0x4a   : > { %v2446_v35 = vpack.c.bf16 %v314_v31, %v307_v30  ;;  %2279 = vmatmul.mubr.f32.vlgmr.msra.gmra.mrb[0].mxu0 %v296_v32  ;;  %2321 = vmatmul.mubr.f32.vlgmr.msra.gmra.mrb[0].mxu1 %v296_v32  ;;  %p2678_p4 = por %p2677_p13, %p2676_p7 }
  0x4b   : > { %v2464_v36 = vpack.c.bf16 %v773_v34, %v766_v33  ;;  %2285 = vmatprep.mubr.msk.f32.mxu0 %vm2771_vm0, %v2772_v1  ;;  %2327 = vmatprep.mubr.msk.f32.mxu1 %vm2771_vm0, %v2772_v1 }
  0x4c   : > { %2447 = vmatpush3.bf16.msra.mxu0 %v2446_v35  ;;  %p2679_p6 = pnand %p2678_p4, %p2672_p0 }
  0x4d   : > { %2465 = vmatpush3.bf16.msra.mxu1 %v2464_v36  ;;  %2448 = vmatprep.subr.bf16.mxu0 %v2770_v0 }
  0x4e   : > { %2466 = vmatprep.subr.bf16.mxu1 %v2770_v0 }
  0x52   : > { %2286 = vmatmul.mubr.f32.vlgmr.msra.gmra.mrb[0].mxu0 %v2952_v12  ;;  %2328 = vmatmul.mubr.f32.vlgmr.msra.gmra.mrb[0].mxu1 %v2952_v12 }
  0x53   : > { %2450 = vmatpush3.bf16.msra.mxu0 %v2449_v37  ;;  %2468 = vmatpush3.bf16.msra.mxu1 %v2467_v38 }
  0x54   : > { %2292 = vmatprep.mubr.msk.f32.mxu0 %vm2771_vm0, %v2772_v1  ;;  %2334 = vmatprep.mubr.msk.f32.mxu1 %vm2771_vm0, %v2772_v1 }
  0x55   : > { %2451 = vmatprep.subr.bf16.mxu0 %v2770_v0  ;;  %2469 = vmatprep.subr.bf16.mxu1 %v2770_v0 }
  0x5a   : > { %2293 = vmatmul.mubr.f32.vlgmr.msra.gmra.mrb[0].mxu0 %v293_v17  ;;  %2335 = vmatmul.mubr.f32.vlgmr.msra.gmra.mrb[0].mxu1 %v293_v17 }
  0x5b   : > { %2453 = vmatpush3.bf16.msra.mxu0 %v2954_v13  ;;  %2471 = vmatpush3.bf16.msra.mxu1 %v2956_v16 }
  0x5c   : > { %2299 = vmatprep.mubr.msk.f32.mxu0 %vm2771_vm0, %v2772_v1  ;;  %2341 = vmatprep.mubr.msk.f32.mxu1 %vm2771_vm0, %v2772_v1 }
  0x5d   : > { %2454 = vmatprep.subr.bf16.mxu0 %v2770_v0  ;;  %2472 = vmatprep.subr.bf16.mxu1 %v2770_v0 }
  0x62   : > { %2300 = vmatmul.mubr.f32.vlgmr.msra.gmra.mrb[0].mxu0 %v294_v22  ;;  %2342 = vmatmul.mubr.f32.vlgmr.msra.gmra.mrb[0].mxu1 %v294_v22 }
  0x63   : > { %2456 = vmatpush3.bf16.msra.mxu0 %v2455_v39  ;;  %2474 = vmatpush3.bf16.msra.mxu1 %v2473_v40 }
  0x64   : > { %2306 = vmatprep.mubr.msk.f32.mxu0 %vm2771_vm0, %v2772_v1  ;;  %2348 = vmatprep.mubr.msk.f32.mxu1 %vm2771_vm0, %v2772_v1 }
  0x65   : > { %2457 = vmatprep.subr.bf16.mxu0 %v2770_v0  ;;  %2475 = vmatprep.subr.bf16.mxu1 %v2770_v0 }
  0x6a   : > { %2307 = vmatmul.mubr.f32.vlgmr.msra.gmra.mrb[0].mxu0 %v2952_v12  ;;  %2349 = vmatmul.mubr.f32.vlgmr.msra.gmra.mrb[0].mxu1 %v2952_v12 }
  0x6b   : > { %2459 = vmatpush3.bf16.msra.mxu0 %v2954_v13  ;;  %2477 = vmatpush3.bf16.msra.mxu1 %v2956_v16 }
  0x6c   : > { %2313 = vmatprep.mubr.msk.f32.mxu0 %vm2771_vm0, %v2772_v1  ;;  %2355 = vmatprep.mubr.msk.f32.mxu1 %vm2771_vm0, %v2772_v1 }
  0x6d   : > { %2478 = vmatprep.subr.bf16.mxu0 %v2770_v0  ;;  %2496 = vmatprep.subr.bf16.mxu1 %v2770_v0 }
  0x72   : > { %2314 = vmatmul.mubr.f32.vlgmr.msra.gmra.mrb[0].mxu0 %v2952_v12  ;;  %2356 = vmatmul.mubr.f32.vlgmr.msra.gmra.mrb[0].mxu1 %v2952_v12 }
  0x73   : > { %2480 = vmatpush3.bf16.msra.mxu0 %v2954_v13  ;;  %2498 = vmatpush3.bf16.msra.mxu1 %v2956_v16 }
  0x74   : > { %2362 = vmatprep.mubr.msk.f32.mxu0 %vm2771_vm0, %v2772_v1  ;;  %2481 = vmatprep.subr.bf16.mxu0 %v2770_v0 }
  0x75   : > { %2404 = vmatprep.mubr.msk.f32.mxu1 %vm2771_vm0, %v2772_v1  ;;  %2499 = vmatprep.subr.bf16.mxu1 %v2770_v0 }
  0xb3   : > { %v1150_v41 = vpop.permute.xlu0 %1149 }
  0xb4   : > { %v1151_v42 = vsel %vm221_vm1, %v1150_v41, 0 }
  0xb5   : > { %v1220_v43 = vand.u32 4294901760, %v1151_v42 }
  0xb7   : > { %v1221_v44 = vsub.f32 %v1151_v42, %v1220_v43 }
  0xb9   : > { %v1222_v45 = vand.u32 4294901760, %v1221_v44 }
  0xbb   : > { %v1223_v46 = vsub.f32 %v1221_v44, %v1222_v45 }
  0xbd   : > { %v1224_v47 = vand.u32 4294901760, %v1223_v46 }
  0xbf   : > { %2363 = vmatmul.mubr.f32.vlgmr.msra.gmra.mrb[2].mxu0 %v1224_v47  ;;  %2405 = vmatmul.mubr.f32.vlgmr.msra.gmra.mrb[2].mxu1 %v1224_v47 }
  0xc0   : > { %2483 = vmatpush3.bf16.msra.mxu0 %v2446_v35  ;;  %2501 = vmatpush3.bf16.msra.mxu1 %v2464_v36 }
  0xc1   : > { %2369 = vmatprep.mubr.msk.f32.mxu0 %vm2771_vm0, %v2772_v1  ;;  %2484 = vmatprep.subr.bf16.mxu0 %v2770_v0 }
  0xc2   : > { %2411 = vmatprep.mubr.msk.f32.mxu1 %vm2771_vm0, %v2772_v1  ;;  %2502 = vmatprep.subr.bf16.mxu1 %v2770_v0 }
  0xc7   : > { %2370 = vmatmul.mubr.f32.vlgmr.msra.gmra.mrb[2].mxu0 %v1220_v43  ;;  %2412 = vmatmul.mubr.f32.vlgmr.msra.gmra.mrb[2].mxu1 %v1220_v43 }
  0xc8   : > { %2486 = vmatpush3.bf16.msra.mxu0 %v2449_v37  ;;  %2504 = vmatpush3.bf16.msra.mxu1 %v2467_v38 }
  0xc9   : > { %2376 = vmatprep.mubr.msk.f32.mxu0 %vm2771_vm0, %v2772_v1  ;;  %2487 = vmatprep.subr.bf16.mxu0 %v2770_v0 }
  0xca   : > { %2418 = vmatprep.mubr.msk.f32.mxu1 %vm2771_vm0, %v2772_v1  ;;  %2505 = vmatprep.subr.bf16.mxu1 %v2770_v0 }
  0xcf   : > { %2377 = vmatmul.mubr.f32.vlgmr.msra.gmra.mrb[2].mxu0 %v1221_v44  ;;  %2419 = vmatmul.mubr.f32.vlgmr.msra.gmra.mrb[2].mxu1 %v1221_v44 }
  0xd0   : > { %2489 = vmatpush3.bf16.msra.mxu0 %v2954_v13  ;;  %2507 = vmatpush3.bf16.msra.mxu1 %v2956_v16 }
  0xd1   : > { %2383 = vmatprep.mubr.msk.f32.mxu0 %vm2771_vm0, %v2772_v1  ;;  %2490 = vmatprep.subr.bf16.mxu0 %v2770_v0 }
  0xd2   : > { %2425 = vmatprep.mubr.msk.f32.mxu1 %vm2771_vm0, %v2772_v1  ;;  %2508 = vmatprep.subr.bf16.mxu1 %v2770_v0 }
  0xd7   : > { %2384 = vmatmul.mubr.f32.vlgmr.msra.gmra.mrb[2].mxu0 %v1222_v45  ;;  %2426 = vmatmul.mubr.f32.vlgmr.msra.gmra.mrb[2].mxu1 %v1222_v45 }
  0xd8   : > { %2492 = vmatpush3.bf16.msra.mxu0 %v2455_v39  ;;  %2510 = vmatpush3.bf16.msra.mxu1 %v2473_v40 }
  0xd9   : > { %2390 = vmatprep.mubr.msk.f32.mxu0 %vm2771_vm0, %v2772_v1  ;;  %2493 = vmatprep.subr.bf16.mxu0 %v2770_v0 }
  0xda   : > { %2432 = vmatprep.mubr.msk.f32.mxu1 %vm2771_vm0, %v2772_v1  ;;  %2511 = vmatprep.subr.bf16.mxu1 %v2770_v0 }
  0xdf   : > { %2391 = vmatmul.mubr.f32.vlgmr.msra.gmra.mrb[2].mxu0 %v1220_v43  ;;  %2433 = vmatmul.mubr.f32.vlgmr.msra.gmra.mrb[2].mxu1 %v1220_v43 }
  0xe0   : > { %2495 = vmatpush3.bf16.msra.mxu0 %v2954_v13  ;;  %2513 = vmatpush3.bf16.msra.mxu1 %v2956_v16 }
  0xe1   : > { %2397 = vmatprep.mubr.msk.f32.mxu0 %vm2771_vm0, %v2772_v1  ;;  %2439 = vmatprep.mubr.msk.f32.mxu1 %vm2771_vm0, %v2772_v1 }
  0xe7   : > { %2398 = vmatmul.mubr.f32.vlgmr.msra.gmra.mrb[2].mxu0 %v1220_v43  ;;  %2440 = vmatmul.mubr.f32.vlgmr.msra.gmra.mrb[2].mxu1 %v1220_v43 }
 0x145   : > { %v680_v48 = vpop.f32.mrb[0].mxu0  ;;  %v1139_v49 = vpop.f32.mrb[0].mxu1 }
 0x146   : > { %1144 = vst.msk [vmem:[%s215_s8] sm:$0xff] %vm1143_vm2, %v680_v48  ;;  %2194 = vst.msk [vmem:[%s215_s8 + $0x10] sm:$0xff] %vm1143_vm2, %v1139_v49  ;;  %v2315_v50 = vpop.f32.mrb[1].mxu0  ;;  %v2357_v51 = vpop.f32.mrb[1].mxu1 }
 0x1ba   : > { %v1608_v52 = vpop.f32.mrb[2].mxu0  ;;  %v2067_v53 = vpop.f32.mrb[2].mxu1 }
 0x1bb   : > { %2195 = vst.msk [vmem:[%s215_s8 + $0x8] sm:$0xff] %vm1143_vm2, %v1608_v52  ;;  %2196 = vst.msk [vmem:[%s215_s8 + $0x18] sm:$0xff] %vm1143_vm2, %v2067_v53  ;;  %v2399_v54 = vpop.f32.mrb[3].mxu0  ;;  %v2441_v55 = vpop.f32.mrb[3].mxu1 }
 0x1bc   : > { %2682 = shalt.err (!%p2679_p6)
}
 0x1bd   : > { %s2683_s25 = scalar_lea.hbm %s3054_s30, 512  ;;  %s2687_s9 = scalar_lea.hbm %s3113_s3, 4096 }
 0x1be   : > { %p2684_p3 = scmp.ne.s32.totalorder %s3054_s30, %s2683_s25  ;;  %p2688_p1 = scmp.lt.u32.totalorder %s3054_s30, %s3113_s3 }
 0x1bf   : > { %p2689_p2 = scmp.lt.u32.totalorder %s2687_s9, %s2683_s25  ;;  %p2691_p8 = scmp.lt.u32.totalorder %s2683_s25, %s3054_s30 }
 0x1c0   : > { %p2685_p10 = pnand %p2684_p3, %p3122_p9 }
 0x1c1   : > { %p2690_p5 = por %p2689_p2, %p2688_p1 }
 0x1c2   : > { %p2686_p11 = pneg %p2685_p10 }
 0x1c3   : > { %p2692_p12 = por %p2691_p8, %p2690_p5 }
 0x1c5   : > { %p2693_p0 = pnand %p2692_p12, %p2686_p11 }
 0x1c7   : > { %2696 = shalt.err (!%p2693_p0)
}
 0x1c8   : > { %s2775_s27 = smov 128   ;;  %s2776_s24 = smov 512  }
 0x1c9   : > { %s2777_s16 = smov 8  }
 0x1ca   : > { %2556 = dma.vmem_to_hbm [thread:$0]  (%p3122_p9), %s3049_s11, 512, %s3054_s30, %s2076_s15, %s2775_s27, %s2776_s24, %s2777_s16  }
 0x1cb PF: > { %p2567_p7 = scmp.ge.s32.totalorder %s2767_s19, 2  ;;  %s2106_s20 = sand.u32 1, %s2739_s12  }
 0x1cc   : > { %p3123_p13 = scmp.ne.s32.totalorder %s3118_s4, 0  ;;  %s2107_s5 = scalar_lea.sflag [#allocation4], %s2106_s20 }
 0x1ce   : > { %p2563_p4 = pnand %p2567_p7, %p3123_p13 }
 0x1d0   : > { %2734 = dma.done.wait (!%p2563_p4), %s2107_s5, 512  }
 0x1d1   : > { %2736 = vsyncadd (!%p2563_p4), %s2107_s5, 4294966784  ;;  %s19_s19 = sadd.s32 1, %s2767_s19   ;;  %s3124_s12 = smov %s2743_s13 }
 0x1d2   : > { %p16_p6 = scmp.ge.s32.totalorder %s19_s19, 10   ;;  %s3125_s13 = smov %s2747_s14 }
 0x1d3   : > { %s3126_s14 = smov %s2876_s6  ;;  %s3127_s15 = smov %s2759_s17 }
 0x1d4   : > { %s3128_s16 = smov %s2763_s18  ;;  %s3129_s17 = smov %s3132_s22 }
 0x1d5   : > { %s3130_s18 = smov %s3136_s23  ;;  %18 = sbr.rel (!%p16_p6) target bundleno = 7 (0x7), region = 80 }
 0x1dc   :  { %2112 = vsyncpa [#allocation3], 1 }
 0x1dd   :  { %2114 = vsyncpa [#allocation3 + $0x1], 1 }
 0x1de   :  { %2115 = vsyncpa [#allocation4], 1 }
 0x1df   :  { %2117 = vsyncpa [#allocation4 + $0x1], 1 }

</bundles_post_ra>
